<compile_context>
chip_gen: v5e
topology: v5e:2x2
jax: 0.10.0
libtpu: 0.0.40
codegen_flags: <defaults>
</compile_context>

<pallas_src>
import jax
import jax.numpy as jnp
from jax.experimental import pallas as pl
from jax.experimental.pallas import tpu as pltpu

LANE = 128     # vreg lane width  -> channel / node dims padded to multiples of this
SUBLANE = 8    # vreg sublane width


def _round_up(x, m):
    return (x + m - 1) // m * m


def _pad2(a, rows, cols):
    return jnp.pad(a, ((0, rows - a.shape[0]), (0, cols - a.shape[1])))


def _vmem_cap_bytes():
    try:
        return int(pltpu.get_tpu_info().vmem_capacity_bytes)
    except Exception:
        return 64 << 20   # conservative fallback (v7x per-TC VMEM)


def _choose_row_tile(n_pad, budget_bytes=None):
    """Largest multiple-of-128 divisor of n_pad whose double-buffered bf16
    adjacency row tile (2 * tile * n_pad * 2B) fits ~1/3 of physical VMEM.
    If the whole A_hat fits, this returns n_pad -> constant adj block index,
    i.e. A_hat is DMA'd once and stays resident across all layers."""
    if budget_bytes is None:
        budget_bytes = _vmem_cap_bytes() // 3
    cap = max(LANE, budget_bytes // (4 * n_pad))
    best, t = LANE, LANE
    while t <= min(n_pad, cap):
        if n_pad % t == 0:
            best = t
        t += LANE
    return best


def _vmem_limit_bytes(row_tile, n_pad, c_max, hid_pad, out_pad, g_pad):
    bf2, f4 = 2, 4
    resident = (
        2 * row_tile * n_pad * bf2                       # A_hat row tile (2 buffers)
        + 2 * n_pad * c_max * bf2                        # x block (constant index)
        + 2 * (c_max * hid_pad + hid_pad * hid_pad) * bf2  # W1,W2 per-layer blocks
        + 2 * 2 * hid_pad * f4                           # b1,b2 blocks
        + 2 * g_pad * row_tile * f4                      # pool column tile
        + 2 * (hid_pad * out_pad + out_pad) * f4         # head W,b
        + 2 * g_pad * out_pad * f4                       # output block
        + 2 * n_pad * c_max * bf2                        # ping-pong h scratch
        + g_pad * hid_pad * f4                           # pooled accumulator
    )
    limit = resident + (16 << 20)                        # compiler scratch slack
    cap = _vmem_cap_bytes()
    return int(min(max(limit, 32 << 20), int(cap * 0.9)))


# ---------------------------------------------------------------------------
# Fused kernel. Grid = (num_layers, n_pad // row_tile), both axes sequential
# ("arbitrary") because activations are carried layer-to-layer through a
# ping-pong VMEM scratch.
#
# Per grid step (l, i):
#   agg  = A_hat[tile_i, :] @ h_l            (bf16 x bf16, f32 MXU accumulation;
#                                             self-term folded into A_hat)
#   h'   = ReLU(agg @ W1[l] + b1[l]) @ W2[l] + b2[l]      (f32 epilogue)
#   l < L-1 : scratch <- bf16(ReLU(h'))      (inter-layer activation)
#   l == L-1: pooled_acc += P[:, tile_i] @ h'; at the last tile
#             out = pooled_acc @ W_head + b_head
# ---------------------------------------------------------------------------
def _fused_gnn_kernel(adj_ref, x_ref, w1_ref, b1_ref, w2_ref, b2_ref,
                      pool_ref, hw_ref, hb_ref, out_ref, h_scr, pool_acc):
    l = pl.program_id(0)                    # layer index (sequential)
    i = pl.program_id(1)                    # destination-node row tile (sequential)
    last_layer = l == pl.num_programs(0) - 1
    last_tile = i == pl.num_programs(1) - 1

    row_tile = adj_ref.shape[0]
    n_pad, c_max = x_ref.shape
    hid_pad = w1_ref.shape[2]

    # One-time staging: layer 0 reads ping-pong slot 1 (rows [n_pad, 2*n_pad)).
    @pl.when((l == 0) & (i == 0))
    def _():
        # Zero slot 0 so columns >= hid_pad can never inject stale VMEM garbage.
        h_scr[0:n_pad, :] = jnp.zeros((n_pad, c_max), jnp.bfloat16)
        h_scr[n_pad:2 * n_pad, :] = x_ref[...]

    read_slot = (l + 1) % 2                 # layer 0 -> slot 1, layer 1 -> slot 0, ...
    write_slot = l % 2

    # Aggregation: A_hat row tile @ full h (bf16 inputs, f32 MXU accumulation).
    roff = pl.multiple_of(read_slot * n_pad, n_pad)
    h_full = h_scr[pl.ds(roff, n_pad), :]                      # (n_pad, c_max) bf16
    agg = jnp.dot(adj_ref[...], h_full,
                  preferred_element_type=jnp.float32)          # (row_tile, c_max) f32

    # GIN MLP: Linear -> ReLU -> Linear. bf16 MXU inputs, f32 bias/ReLU epilogue.
    z = jnp.maximum(
        jnp.dot(agg.astype(jnp.bfloat16), w1_ref[0],
                preferred_element_type=jnp.float32) + b1_ref[0], 0.0)
    h_out = jnp.dot(z.astype(jnp.bfloat16), w2_ref[0],
                    preferred_element_type=jnp.float32) + b2_ref[0]

    # Inter-layer ReLU + bf16 store into the ping-pong scratch (BasicGNN applies
    # no activation/dropout after the final conv layer).
    @pl.when(jnp.logical_not(last_layer))
    def _():
        woff = pl.multiple_of(write_slot * n_pad + i * row_tile, row_tile)
        h_scr[pl.ds(woff, row_tile), 0:hid_pad] = (
            jnp.maximum(h_out, 0.0).astype(jnp.bfloat16))

    # Fused global_mean_pool + Linear head, accumulated over the final layer's tiles.
    @pl.when(last_layer & (i == 0))
    def _():
        pool_acc[...] = jnp.zeros_like(pool_acc)

    @pl.when(last_layer)
    def _():
        pool_acc[...] += jnp.dot(pool_ref[...], h_out,
                                 preferred_element_type=jnp.float32)

    @pl.when(last_layer & last_tile)
    def _():
        out_ref[...] = (
            jnp.dot(pool_acc[...], hw_ref[...],
                    preferred_element_type=jnp.float32) + hb_ref[...])


def _fused_gnn(a_hat, x_p, w1_s, b1_s, w2_s, b2_s, pool_p, hw_p, hb_p,
               *, row_tile, g_pad, out_pad, vmem_limit):
    num_layers = w1_s.shape[0]
    n_pad = a_hat.shape[0]
    c_max = x_p.shape[1]
    hid_pad = w1_s.shape[2]
    n_tiles = n_pad // row_tile
    grid = (num_layers, n_tiles)

    return pl.pallas_call(
        _fused_gnn_kernel,
        out_shape=jax.ShapeDtypeStruct((g_pad, out_pad), jnp.float32),
        grid=grid,
        in_specs=[
            pl.BlockSpec((row_tile, n_pad), lambda l, i: (i, 0)),        # A_hat tile
            pl.BlockSpec((n_pad, c_max), lambda l, i: (0, 0)),           # x (resident)
            pl.BlockSpec((1, c_max, hid_pad), lambda l, i: (l, 0, 0)),   # W1[l]
            pl.BlockSpec((1, 1, hid_pad), lambda l, i: (l, 0, 0)),       # b1[l]
            pl.BlockSpec((1, hid_pad, hid_pad), lambda l, i: (l, 0, 0)), # W2[l]
            pl.BlockSpec((1, 1, hid_pad), lambda l, i: (l, 0, 0)),       # b2[l]
            pl.BlockSpec((g_pad, row_tile), lambda l, i: (0, i)),        # pool cols
            pl.BlockSpec((hid_pad, out_pad), lambda l, i: (0, 0)),       # head W
            pl.BlockSpec((1, out_pad), lambda l, i: (0, 0)),             # head b
        ],
        out_specs=pl.BlockSpec((g_pad, out_pad), lambda l, i: (0, 0)),
        scratch_shapes=[
            pltpu.VMEM((2 * n_pad, c_max), jnp.bfloat16),   # ping-pong activations
            pltpu.VMEM((g_pad, hid_pad), jnp.float32),      # pooled accumulator
        ],
        compiler_params=pltpu.CompilerParams(
            # Both axes sequential: activations are carried through VMEM scratch,
            # so row tiles of layer l+1 depend on every row tile of layer l.
            dimension_semantics=("arbitrary", "arbitrary"),
            vmem_limit_bytes=vmem_limit,
        ),
    )(a_hat, x_p, w1_s, b1_s, w2_s, b2_s, pool_p, hw_p, hb_p)


# ---------------------------------------------------------------------------
# Glue. prepare_gnn_inputs does all O(N^2) padding / bf16 casting / weight
# stacking and can be hoisted out of a repeated-inference loop.
# ---------------------------------------------------------------------------
def prepare_gnn_inputs(x, adj, pool, layer_params, head_w, head_b, *, eps=0.0,
                       row_tile=None):
    n, c_in = x.shape
    num_graphs = pool.shape[0]
    hidden = layer_params[0][0].shape[1]
    out_channels = head_w.shape[1]

    n_pad = _round_up(max(n, LANE), LANE)
    c_in_pad = _round_up(c_in, LANE)
    hid_pad = _round_up(hidden, LANE)
    out_pad = _round_up(out_channels, LANE)
    c_max = max(c_in_pad, hid_pad)
    g_pad = _round_up(max(num_graphs, SUBLANE), SUBLANE)

    if row_tile is None:
        row_tile = _choose_row_tile(n_pad)
    assert n_pad % row_tile == 0 and row_tile % SUBLANE == 0

    # GIN self-term folded into the adjacency: A_hat = A + (1+eps)*I. Values are
    # exact small integers for eps=0 -> bf16 storage is lossless and halves the
    # HBM/VMEM traffic of the dominant [N,N] buffer.
    a_hat = adj + (1.0 + eps) * jnp.eye(n, dtype=adj.dtype)
    a_hat = _pad2(a_hat, n_pad, n_pad).astype(jnp.bfloat16)

    x_p = _pad2(x, n_pad, c_max).astype(jnp.bfloat16)
    pool_p = _pad2(pool, g_pad, n_pad).astype(jnp.float32)

    w1_s = jnp.stack([_pad2(w1, c_max, hid_pad) for (w1, _, _, _) in layer_params]
                     ).astype(jnp.bfloat16)
    b1_s = jnp.stack([_pad2(b1, 1, hid_pad) for (_, b1, _, _) in layer_params]
                     ).astype(jnp.float32)
    w2_s = jnp.stack([_pad2(w2, hid_pad, hid_pad) for (_, _, w2, _) in layer_params]
                     ).astype(jnp.bfloat16)
    b2_s = jnp.stack([_pad2(b2, 1, hid_pad) for (_, _, _, b2) in layer_params]
                     ).astype(jnp.float32)

    hw_p = _pad2(head_w, hid_pad, out_pad).astype(jnp.float32)
    hb_p = _pad2(head_b, 1, out_pad).astype(jnp.float32)

    vmem_limit = _vmem_limit_bytes(row_tile, n_pad, c_max, hid_pad, out_pad, g_pad)
    arrays = (a_hat, x_p, w1_s, b1_s, w2_s, b2_s, pool_p, hw_p, hb_p)
    meta = dict(row_tile=row_tile, g_pad=g_pad, out_pad=out_pad,
                num_graphs=num_graphs, out_channels=out_channels,
                vmem_limit=vmem_limit)
    return arrays, meta


def gnn_forward(x, adj, pool, layer_params, head_w, head_b, *, eps=0.0,
                row_tile=None):
    arrays, meta = prepare_gnn_inputs(x, adj, pool, layer_params, head_w, head_b,
                                      eps=eps, row_tile=row_tile)
    out = _fused_gnn(*arrays,
                     row_tile=meta["row_tile"], g_pad=meta["g_pad"],
                     out_pad=meta["out_pad"], vmem_limit=meta["vmem_limit"])
    return out[:meta["num_graphs"], :meta["out_channels"]]


def _reference_forward(x, adj, pool, layer_params, head_w, head_b, eps=0.0):
    # GINConv(eps=0): MLP((1+eps)*x_i + sum_{j in N(i)} x_j) == MLP(A_hat @ h)
    a_hat = adj + (1.0 + eps) * jnp.eye(x.shape[0], dtype=adj.dtype)
    h = x
    num_layers = len(layer_params)
    for l, (w1, b1, w2, b2) in enumerate(layer_params):
        agg = a_hat @ h
        h = jnp.maximum(agg @ w1 + b1, 0.0) @ w2 + b2
        if l < num_layers - 1:
            h = jnp.maximum(h, 0.0)
    return pool @ h @ head_w + head_b


if __name__ == "__main__":
    IN_CHANNELS = 8
    HIDDEN = 32
    NUM_LAYERS = 3
    OUT_CHANNELS = 4
    NODES_PER_GRAPH = 8
    NUM_GRAPHS = 2
    N = NODES_PER_GRAPH * NUM_GRAPHS  # 16 nodes total

    key = jax.random.PRNGKey(0)
    k_x, k_p = jax.random.split(key)

    # Node features.
    x = jax.random.normal(k_x, (N, IN_CHANNELS), dtype=jnp.float32)

    # edge_index: bidirectional ring within each graph (PyG: [src; dst]).
    src_list, dst_list = [], []
    for g in range(NUM_GRAPHS):
        base = g * NODES_PER_GRAPH
        for i in range(NODES_PER_GRAPH):
            a = base + i
            b = base + (i + 1) % NODES_PER_GRAPH
            src_list += [a, b]
            dst_list += [b, a]
    src = jnp.asarray(src_list, dtype=jnp.int32)
    dst = jnp.asarray(dst_list, dtype=jnp.int32)

    # Dense adjacency: A[dst, src] = 1 (message flows src -> dst).
    adj = jnp.zeros((N, N), dtype=jnp.float32).at[dst, src].add(1.0)

    # Mean-pool matrix P[g, n] = 1/|V_g| if batch[n] == g.
    batch = jnp.repeat(jnp.arange(NUM_GRAPHS, dtype=jnp.int32), NODES_PER_GRAPH)
    one_hot = (batch[None, :] == jnp.arange(NUM_GRAPHS)[:, None]).astype(jnp.float32)
    pool = one_hot / jnp.sum(one_hot, axis=1, keepdims=True)

    # Deterministic parameter init (GIN per-layer MLP: [c_in -> H -> H]).
    def linear_init(k, fan_in, fan_out):
        kw, kb = jax.random.split(k)
        scale = 1.0 / jnp.sqrt(jnp.float32(fan_in))
        w = jax.random.uniform(kw, (fan_in, fan_out), jnp.float32, -scale, scale)
        b = jax.random.uniform(kb, (1, fan_out), jnp.float32, -scale, scale)
        return w, b

    keys = jax.random.split(k_p, 2 * NUM_LAYERS + 1)
    layer_params = []
    c_in = IN_CHANNELS
    for l in range(NUM_LAYERS):
        w1, b1 = linear_init(keys[2 * l + 0], c_in, HIDDEN)
        w2, b2 = linear_init(keys[2 * l + 1], HIDDEN, HIDDEN)
        layer_params.append((w1, b1, w2, b2))
        c_in = HIDDEN
    head_w, head_b = linear_init(keys[-1], HIDDEN, OUT_CHANNELS)

    # Auto row_tile: N is padded to 128, the whole bf16 A_hat fits VMEM, so the
    # fused kernel keeps it resident across all 3 layers (grid = (3, 1)).
    out = gnn_forward(x, adj, pool, layer_params, head_w, head_b)
    out = jax.block_until_ready(out)

    ref = _reference_forward(x, adj, pool, layer_params, head_w, head_b)
    assert out.shape == (NUM_GRAPHS, OUT_CHANNELS)
    # Tolerance covers bf16 inputs / activations (f32 MXU accumulation) in the
    # Pallas path vs. the default-precision f32 XLA reference.
    assert jnp.allclose(out, ref, rtol=2e-2, atol=2e-2), (out, ref)

    print("KERNEL_OK")
</pallas_src>

<mosaic_0001>
module attributes {stable_mosaic.version = 11 : i64} {
  func.func @_fused_gnn_kernel(%arg0: i32, %arg1: i32, %arg2: memref<128x128xbf16, #tpu.memory_space<vmem>>, %arg3: memref<128x128xbf16, #tpu.memory_space<vmem>>, %arg4: memref<1x128x128xbf16, #tpu.memory_space<vmem>>, %arg5: memref<1x1x128xf32, #tpu.memory_space<vmem>>, %arg6: memref<1x128x128xbf16, #tpu.memory_space<vmem>>, %arg7: memref<1x1x128xf32, #tpu.memory_space<vmem>>, %arg8: memref<8x128xf32, #tpu.memory_space<vmem>>, %arg9: memref<128x128xf32, #tpu.memory_space<vmem>>, %arg10: memref<1x128xf32, #tpu.memory_space<vmem>>, %arg11: memref<8x128xf32, #tpu.memory_space<vmem>>, %arg12: memref<256x128xbf16, #tpu.memory_space<vmem>>, %arg13: memref<8x128xf32, #tpu.memory_space<vmem>>) attributes {dimension_semantics = [#tpu.dimension_semantics<arbitrary>, #tpu.dimension_semantics<arbitrary>], iteration_bounds = array<i64: 3, 1>, scalar_prefetch = 0 : i64, scratch_operands = 2 : i64, tpu.core_type = #tpu.core_type<tc>, window_params = [{transform_indices = @transform_0, window_bounds = array<i64: 128, 128>}, {pipeline_mode = #tpu.pipeline_mode<synchronous>, transform_indices = @transform_1, window_bounds = array<i64: 128, 128>}, {transform_indices = @transform_2, window_bounds = array<i64: 1, 128, 128>}, {transform_indices = @transform_3, window_bounds = array<i64: 1, 1, 128>}, {transform_indices = @transform_4, window_bounds = array<i64: 1, 128, 128>}, {transform_indices = @transform_5, window_bounds = array<i64: 1, 1, 128>}, {transform_indices = @transform_6, window_bounds = array<i64: 8, 128>}, {pipeline_mode = #tpu.pipeline_mode<synchronous>, transform_indices = @transform_7, window_bounds = array<i64: 128, 128>}, {pipeline_mode = #tpu.pipeline_mode<synchronous>, transform_indices = @transform_8, window_bounds = array<i64: 1, 128>}, {pipeline_mode = #tpu.pipeline_mode<synchronous>, transform_indices = @transform_9, window_bounds = array<i64: 8, 128>}]} {
    %c2_i32 = arith.constant 2 : i32
    %0 = arith.cmpi eq, %arg0, %c2_i32 : i32
    %c0_i32 = arith.constant 0 : i32
    %1 = arith.cmpi eq, %arg1, %c0_i32 : i32
    %c0_i32_0 = arith.constant 0 : i32
    %2 = arith.cmpi eq, %arg0, %c0_i32_0 : i32
    %c0_i32_1 = arith.constant 0 : i32
    %3 = arith.cmpi eq, %arg1, %c0_i32_1 : i32
    %4 = arith.andi %2, %3 : i1
    %5 = arith.extui %4 : i1 to i32
    %c0_i32_2 = arith.constant 0 : i32
    %6 = arith.cmpi ne, %5, %c0_i32_2 : i32
    scf.if %6 {
      %cst_37 = arith.constant 0.000000e+00 : bf16
      %64 = vector.broadcast %cst_37 : bf16 to vector<128x128xbf16>
      %c0_38 = arith.constant 0 : index
      %c0_39 = arith.constant 0 : index
      %65 = vector.load %arg12[%c0_38, %c0_39] : memref<256x128xbf16, #tpu.memory_space<vmem>>, vector<128x128xbf16>
      tpu.vector_store %arg12[%c0_38, %c0_39], %64 {strides = array<i32>} : memref<256x128xbf16, #tpu.memory_space<vmem>>, vector<128x128xbf16>,
      %c0_40 = arith.constant 0 : index
      %c0_41 = arith.constant 0 : index
      %66 = vector.load %arg3[%c0_40, %c0_41] : memref<128x128xbf16, #tpu.memory_space<vmem>>, vector<128x128xbf16>
      %c128 = arith.constant 128 : index
      %c0_42 = arith.constant 0 : index
      %67 = vector.load %arg12[%c128, %c0_42] : memref<256x128xbf16, #tpu.memory_space<vmem>>, vector<128x128xbf16>
      tpu.vector_store %arg12[%c128, %c0_42], %66 {strides = array<i32>} : memref<256x128xbf16, #tpu.memory_space<vmem>>, vector<128x128xbf16>,
    } else {
    }
    %c1_i32 = arith.constant 1 : i32
    %7 = arith.addi %arg0, %c1_i32 : i32
    %c2_i32_3 = arith.constant 2 : i32
    %c0_i32_4 = arith.constant 0 : i32
    %8 = arith.cmpi eq, %c2_i32_3, %c0_i32_4 : i32
    %c1_i32_5 = arith.constant 1 : i32
    %9 = arith.select %8, %c1_i32_5, %c2_i32_3 : i32
    %10 = arith.remsi %7, %9 : i32
    %c0_i32_6 = arith.constant 0 : i32
    %11 = arith.cmpi ne, %10, %c0_i32_6 : i32
    %c0_i32_7 = arith.constant 0 : i32
    %12 = arith.cmpi slt, %10, %c0_i32_7 : i32
    %c0_i32_8 = arith.constant 0 : i32
    %13 = arith.cmpi slt, %9, %c0_i32_8 : i32
    %14 = arith.xori %12, %13 : i1
    %15 = arith.andi %14, %11 : i1
    %16 = arith.addi %10, %9 : i32
    %17 = arith.select %15, %16, %10 : i32
    %c2_i32_9 = arith.constant 2 : i32
    %c0_i32_10 = arith.constant 0 : i32
    %18 = arith.cmpi eq, %c2_i32_9, %c0_i32_10 : i32
    %c1_i32_11 = arith.constant 1 : i32
    %19 = arith.select %18, %c1_i32_11, %c2_i32_9 : i32
    %20 = arith.remsi %arg0, %19 : i32
    %c0_i32_12 = arith.constant 0 : i32
    %21 = arith.cmpi ne, %20, %c0_i32_12 : i32
    %c0_i32_13 = arith.constant 0 : i32
    %22 = arith.cmpi slt, %20, %c0_i32_13 : i32
    %c0_i32_14 = arith.constant 0 : i32
    %23 = arith.cmpi slt, %19, %c0_i32_14 : i32
    %24 = arith.xori %22, %23 : i1
    %25 = arith.andi %24, %21 : i1
    %26 = arith.addi %20, %19 : i32
    %27 = arith.select %25, %26, %20 : i32
    %c128_i32 = arith.constant 128 : i32
    %28 = arith.muli %17, %c128_i32 : i32
    %29 = tpu.assume_multiple %28, 128 : i32
    %30 = arith.index_cast %29 : i32 to index
    %c0 = arith.constant 0 : index
    %31 = vector.load %arg12[%30, %c0] : memref<256x128xbf16, #tpu.memory_space<vmem>>, vector<128x128xbf16>
    %c0_15 = arith.constant 0 : index
    %c0_16 = arith.constant 0 : index
    %32 = vector.load %arg2[%c0_15, %c0_16] : memref<128x128xbf16, #tpu.memory_space<vmem>>, vector<128x128xbf16>
    %cst = arith.constant dense<0.000000e+00> : vector<128x128xf32>
    %33 = tpu.matmul %32, %31, %cst {dimension_numbers = #tpu.dot_dimension_numbers<[1], [0], [0], [1], [0, 0, 1, 1], [], []>} : vector<128x128xbf16>, vector<128x128xbf16>, vector<128x128xf32> -> vector<128x128xf32>
    %34 = arith.truncf %33 : vector<128x128xf32> to vector<128x128xbf16>
    %c0_17 = arith.constant 0 : index
    %c0_18 = arith.constant 0 : index
    %c0_19 = arith.constant 0 : index
    %35 = vector.load %arg4[%c0_17, %c0_18, %c0_19] : memref<1x128x128xbf16, #tpu.memory_space<vmem>>, vector<1x128x128xbf16>
    %36 = vector.shape_cast %35 : vector<1x128x128xbf16> to vector<128x128xbf16>
    %cst_20 = arith.constant dense<0.000000e+00> : vector<128x128xf32>
    %37 = tpu.matmul %34, %36, %cst_20 {dimension_numbers = #tpu.dot_dimension_numbers<[1], [0], [0], [1], [0, 0, 1, 1], [], []>} : vector<128x128xbf16>, vector<128x128xbf16>, vector<128x128xf32> -> vector<128x128xf32>
    %c0_21 = arith.constant 0 : index
    %c0_22 = arith.constant 0 : index
    %c0_23 = arith.constant 0 : index
    %38 = vector.load %arg5[%c0_21, %c0_22, %c0_23] : memref<1x1x128xf32, #tpu.memory_space<vmem>>, vector<1x1x128xf32>
    %39 = vector.shape_cast %38 : vector<1x1x128xf32> to vector<1x128xf32>
    %40 = vector.broadcast %39 : vector<1x128xf32> to vector<128x128xf32>
    %41 = arith.addf %37, %40 : vector<128x128xf32>
    %cst_24 = arith.constant 0.000000e+00 : f32
    %42 = vector.broadcast %cst_24 : f32 to vector<128x128xf32>
    %43 = arith.maximumf %41, %42 : vector<128x128xf32>
    %44 = arith.truncf %43 : vector<128x128xf32> to vector<128x128xbf16>
    %c0_25 = arith.constant 0 : index
    %c0_26 = arith.constant 0 : index
    %c0_27 = arith.constant 0 : index
    %45 = vector.load %arg6[%c0_25, %c0_26, %c0_27] : memref<1x128x128xbf16, #tpu.memory_space<vmem>>, vector<1x128x128xbf16>
    %46 = vector.shape_cast %45 : vector<1x128x128xbf16> to vector<128x128xbf16>
    %cst_28 = arith.constant dense<0.000000e+00> : vector<128x128xf32>
    %47 = tpu.matmul %44, %46, %cst_28 {dimension_numbers = #tpu.dot_dimension_numbers<[1], [0], [0], [1], [0, 0, 1, 1], [], []>} : vector<128x128xbf16>, vector<128x128xbf16>, vector<128x128xf32> -> vector<128x128xf32>
    %c0_29 = arith.constant 0 : index
    %c0_30 = arith.constant 0 : index
    %c0_31 = arith.constant 0 : index
    %48 = vector.load %arg7[%c0_29, %c0_30, %c0_31] : memref<1x1x128xf32, #tpu.memory_space<vmem>>, vector<1x1x128xf32>
    %49 = vector.shape_cast %48 : vector<1x1x128xf32> to vector<1x128xf32>
    %50 = vector.broadcast %49 : vector<1x128xf32> to vector<128x128xf32>
    %51 = arith.addf %47, %50 : vector<128x128xf32>
    %true = arith.constant true
    %52 = arith.xori %0, %true : i1
    %53 = arith.extui %52 : i1 to i32
    %c0_i32_32 = arith.constant 0 : i32
    %54 = arith.cmpi ne, %53, %c0_i32_32 : i32
    scf.if %54 {
      %c128_i32_37 = arith.constant 128 : i32
      %64 = arith.muli %27, %c128_i32_37 : i32
      %c128_i32_38 = arith.constant 128 : i32
      %65 = arith.muli %arg1, %c128_i32_38 : i32
      %66 = arith.addi %64, %65 : i32
      %67 = tpu.assume_multiple %66, 128 : i32
      %cst_39 = arith.constant 0.000000e+00 : f32
      %68 = vector.broadcast %cst_39 : f32 to vector<128x128xf32>
      %69 = arith.maximumf %51, %68 : vector<128x128xf32>
      %70 = arith.truncf %69 : vector<128x128xf32> to vector<128x128xbf16>
      %71 = arith.index_cast %67 : i32 to index
      %c0_40 = arith.constant 0 : index
      %72 = vector.load %arg12[%71, %c0_40] : memref<256x128xbf16, #tpu.memory_space<vmem>>, vector<128x128xbf16>
      tpu.vector_store %arg12[%71, %c0_40], %70 {strides = array<i32>} : memref<256x128xbf16, #tpu.memory_space<vmem>>, vector<128x128xbf16>,
    } else {
    }
    %c0_i32_33 = arith.constant 0 : i32
    %55 = arith.cmpi eq, %arg1, %c0_i32_33 : i32
    %56 = arith.andi %0, %55 : i1
    %57 = arith.extui %56 : i1 to i32
    %c0_i32_34 = arith.constant 0 : i32
    %58 = arith.cmpi ne, %57, %c0_i32_34 : i32
    scf.if %58 {
      %cst_37 = arith.constant 0.000000e+00 : f32
      %64 = vector.broadcast %cst_37 : f32 to vector<8x128xf32>
      %c0_38 = arith.constant 0 : index
      %c0_39 = arith.constant 0 : index
      %65 = vector.load %arg13[%c0_38, %c0_39] : memref<8x128xf32, #tpu.memory_space<vmem>>, vector<8x128xf32>
      tpu.vector_store %arg13[%c0_38, %c0_39], %64 {strides = array<i32>} : memref<8x128xf32, #tpu.memory_space<vmem>>, vector<8x128xf32>,
    } else {
    }
    %59 = arith.extui %0 : i1 to i32
    %c0_i32_35 = arith.constant 0 : i32
    %60 = arith.cmpi ne, %59, %c0_i32_35 : i32
    scf.if %60 {
      %c0_37 = arith.constant 0 : index
      %c0_38 = arith.constant 0 : index
      %64 = vector.load %arg13[%c0_37, %c0_38] : memref<8x128xf32, #tpu.memory_space<vmem>>, vector<8x128xf32>
      %c0_39 = arith.constant 0 : index
      %c0_40 = arith.constant 0 : index
      %65 = vector.load %arg8[%c0_39, %c0_40] : memref<8x128xf32, #tpu.memory_space<vmem>>, vector<8x128xf32>
      %cst_41 = arith.constant dense<0.000000e+00> : vector<8x128xf32>
      %66 = tpu.matmul %65, %51, %cst_41 {dimension_numbers = #tpu.dot_dimension_numbers<[1], [0], [0], [1], [0, 0, 1, 1], [], []>} : vector<8x128xf32>, vector<128x128xf32>, vector<8x128xf32> -> vector<8x128xf32>
      %67 = arith.addf %64, %66 : vector<8x128xf32>
      %c0_42 = arith.constant 0 : index
      %c0_43 = arith.constant 0 : index
      %68 = vector.load %arg13[%c0_42, %c0_43] : memref<8x128xf32, #tpu.memory_space<vmem>>, vector<8x128xf32>
      tpu.vector_store %arg13[%c0_42, %c0_43], %67 {strides = array<i32>} : memref<8x128xf32, #tpu.memory_space<vmem>>, vector<8x128xf32>,
    } else {
    }
    %61 = arith.andi %0, %1 : i1
    %62 = arith.extui %61 : i1 to i32
    %c0_i32_36 = arith.constant 0 : i32
    %63 = arith.cmpi ne, %62, %c0_i32_36 : i32
    scf.if %63 {
      %c0_37 = arith.constant 0 : index
      %c0_38 = arith.constant 0 : index
      %64 = vector.load %arg13[%c0_37, %c0_38] : memref<8x128xf32, #tpu.memory_space<vmem>>, vector<8x128xf32>
      %c0_39 = arith.constant 0 : index
      %c0_40 = arith.constant 0 : index
      %65 = vector.load %arg9[%c0_39, %c0_40] : memref<128x128xf32, #tpu.memory_space<vmem>>, vector<128x128xf32>
      %cst_41 = arith.constant dense<0.000000e+00> : vector<8x128xf32>
      %66 = tpu.matmul %64, %65, %cst_41 {dimension_numbers = #tpu.dot_dimension_numbers<[1], [0], [0], [1], [0, 0, 1, 1], [], []>} : vector<8x128xf32>, vector<128x128xf32>, vector<8x128xf32> -> vector<8x128xf32>
      %c0_42 = arith.constant 0 : index
      %c0_43 = arith.constant 0 : index
      %67 = vector.load %arg10[%c0_42, %c0_43] : memref<1x128xf32, #tpu.memory_space<vmem>>, vector<1x128xf32>
      %68 = vector.broadcast %67 : vector<1x128xf32> to vector<8x128xf32>
      %69 = arith.addf %66, %68 : vector<8x128xf32>
      %c0_44 = arith.constant 0 : index
      %c0_45 = arith.constant 0 : index
      %70 = vector.load %arg11[%c0_44, %c0_45] : memref<8x128xf32, #tpu.memory_space<vmem>>, vector<8x128xf32>
      tpu.vector_store %arg11[%c0_44, %c0_45], %69 {strides = array<i32>} : memref<8x128xf32, #tpu.memory_space<vmem>>, vector<8x128xf32>,
    } else {
    }
    return
  }
  func.func @transform_0(%arg0: i32, %arg1: i32) -> (i32, i32) {
    %c0_i32 = arith.constant 0 : i32
    %c0_i32_0 = arith.constant 0 : i32
    return %arg1, %c0_i32 : i32, i32
  }
  func.func @transform_1(%arg0: i32, %arg1: i32) -> (i32, i32) {
    %c0_i32 = arith.constant 0 : i32
    %c0_i32_0 = arith.constant 0 : i32
    %c0_i32_1 = arith.constant 0 : i32
    return %c0_i32, %c0_i32_0 : i32, i32
  }
  func.func @transform_2(%arg0: i32, %arg1: i32) -> (i32, i32, i32) {
    %c0_i32 = arith.constant 0 : i32
    %c0_i32_0 = arith.constant 0 : i32
    %c0_i32_1 = arith.constant 0 : i32
    return %arg0, %c0_i32, %c0_i32_0 : i32, i32, i32
  }
  func.func @transform_3(%arg0: i32, %arg1: i32) -> (i32, i32, i32) {
    %c0_i32 = arith.constant 0 : i32
    %c0_i32_0 = arith.constant 0 : i32
    %c0_i32_1 = arith.constant 0 : i32
    return %arg0, %c0_i32, %c0_i32_0 : i32, i32, i32
  }
  func.func @transform_4(%arg0: i32, %arg1: i32) -> (i32, i32, i32) {
    %c0_i32 = arith.constant 0 : i32
    %c0_i32_0 = arith.constant 0 : i32
    %c0_i32_1 = arith.constant 0 : i32
    return %arg0, %c0_i32, %c0_i32_0 : i32, i32, i32
  }
  func.func @transform_5(%arg0: i32, %arg1: i32) -> (i32, i32, i32) {
    %c0_i32 = arith.constant 0 : i32
    %c0_i32_0 = arith.constant 0 : i32
    %c0_i32_1 = arith.constant 0 : i32
    return %arg0, %c0_i32, %c0_i32_0 : i32, i32, i32
  }
  func.func @transform_6(%arg0: i32, %arg1: i32) -> (i32, i32) {
    %c0_i32 = arith.constant 0 : i32
    %c0_i32_0 = arith.constant 0 : i32
    return %c0_i32, %arg1 : i32, i32
  }
  func.func @transform_7(%arg0: i32, %arg1: i32) -> (i32, i32) {
    %c0_i32 = arith.constant 0 : i32
    %c0_i32_0 = arith.constant 0 : i32
    %c0_i32_1 = arith.constant 0 : i32
    return %c0_i32, %c0_i32_0 : i32, i32
  }
  func.func @transform_8(%arg0: i32, %arg1: i32) -> (i32, i32) {
    %c0_i32 = arith.constant 0 : i32
    %c0_i32_0 = arith.constant 0 : i32
    %c0_i32_1 = arith.constant 0 : i32
    return %c0_i32, %c0_i32_0 : i32, i32
  }
  func.func @transform_9(%arg0: i32, %arg1: i32) -> (i32, i32) {
    %c0_i32 = arith.constant 0 : i32
    %c0_i32_0 = arith.constant 0 : i32
    %c0_i32_1 = arith.constant 0 : i32
    return %c0_i32, %c0_i32_0 : i32, i32
  }
}

</mosaic_0001>

<bundles_post_ra>
// kernel: tpu_custom_call.1
= control target key start
LH: loop header
LB: loop body
LE: loop exit
PB: predicated region body
PF: predicated region fallthrough
CT: control target
= control target key end

     0   :  { %s2388_s0 = inlined_call_operand.hbm [shape: bf16[128,128], index: 0, kind: input, shape index: {}]   ;;  %s2389_s1 = inlined_call_operand.hbm [shape: bf16[128,128], index: 1, kind: input, shape index: {}]   ;;  %s2390_s2 = inlined_call_operand.hbm [shape: bf16[3,128,128], index: 2, kind: input, shape index: {}]   ;;  %s2391_s3 = inlined_call_operand.hbm [shape: f32[3,1,128], index: 3, kind: input, shape index: {}]   ;;  %s2392_s4 = inlined_call_operand.hbm [shape: bf16[3,128,128], index: 4, kind: input, shape index: {}]   ;;  %s2393_s5 = inlined_call_operand.vmem [shape: f32[3,1,128], index: 5, kind: input, shape index: {}]   ;;  %s2394_s6 = inlined_call_operand.hbm [shape: f32[8,128], index: 6, kind: input, shape index: {}]   ;;  %s2395_s7 = inlined_call_operand.hbm [shape: f32[128,128], index: 7, kind: input, shape index: {}]   ;;  %s2396_s8 = inlined_call_operand.vmem [shape: f32[1,128], index: 8, kind: input, shape index: {}]   ;;  %s2397_s9 = inlined_call_operand.hbm [shape: f32[8,128], index: 9, kind: output, shape index: {}]  }
   0x1   :  { %2405 = sst [smem:[#allocation25_spill]] %s2388_s0 }
   0x2   :  { %2406 = sst [smem:[#allocation26_spill]] %s2389_s1 }
   0x3   :  { %2407 = sst [smem:[#allocation27_spill]] %s2390_s2 }
   0x4   :  { %2408 = sst [smem:[#allocation28_spill]] %s2391_s3 }
   0x5   :  { %2409 = sst [smem:[#allocation29_spill]] %s2394_s6 }
   0x6   :  { %2410 = sst [smem:[#allocation30_spill]] %s2397_s9 }
   0x7   :  { %14 = vsyncpa [#allocation5], 0 }
   0x8   :  { %15 = vsyncpa [#allocation8], 0 }
   0x9   :  { %16 = vsyncpa [#allocation14], 0 }
   0xa   :  { %17 = vsyncpa [#allocation6], 0  ;;  %s2105_s30 = smov 0   ;;  %s2107_s10 = smov 0  }
   0xb   :  { %s2109_s11 = smov 0   ;;  %s2111_s12 = smov 0  }
   0xc   :  { %s2113_s13 = smov 0   ;;  %s2115_s14 = smov 0  }
   0xd LB: > { %2411 = sst [smem:[#allocation22_spill]] %s2030_s11  ;;  %s2134_s15 = sadd.s32 4294967295, %s2042_s14   ;;  %s2042_s14 = sphi %s2115_s14, %s23_s14   ;;  %s2038_s13 = sphi %s2113_s13, %s2434_s13   ;;  %s2034_s12 = sphi %s2111_s12, %s2433_s12   ;;  %s2030_s11 = sphi %s2109_s11, %s2429_s11   ;;  %s2026_s10 = sphi %s2107_s10, %s2432_s10   ;;  %s2022_s30 = sphi %s2105_s30, %s2431_s30  }
   0xe   : > { %p102_p0 = scmp.ne.s32.totalorder %s2026_s10, %s2022_s30  ;;  %p103_p1 = scmp.eq.s32.totalorder %s2134_s15, 0 }
   0xf   : > { %p1340_p2 = scmp.ge.s32.totalorder %s2042_s14, 1  ;;  %p280_p3 = scmp.lt.s32.totalorder %s2042_s14, 4 }
  0x10   : > { %p2142_p4 = por %p103_p1, %p102_p0  ;;  %s2413_s0 = sld [smem:[#allocation25_spill]] }
  0x11   : > { %p2149_p5 = pnand %p1340_p2, %p280_p3  ;;  %s2044_s21 = smov [#allocation4]  }
  0x12   : > { %s296_s22 = sshll.u32 %s2044_s21, 4  ;;  %s2398_s24 = smov 64   ;;  %s297_s22 = int_to_ptr.vmem [resolvable:$true] %s296_s22 }
  0x13   : > { %p1638_p6 = pneg %p2149_p5  ;;  %s2400_s25 = smov 4  }
  0x14   : > { %s35_s26 = sadd.s32 1, %s2038_s13  ;;  %s89_s27 = sadd.s32 1, %s2030_s11 }
  0x15   : > { %p2157_p7 = pnand %p1638_p6, %p103_p1  ;;  %p37_p8 = scmp.ge.s32.totalorder %s35_s26, 3 }
  0x16   : > { %s294_s19 = sshll.u32 %s2413_s0, 4  ;;  %p96_p9 = scmp.ne.s32.totalorder %s2030_s11, %s2026_s10  ;;  %s295_s19 = int_to_ptr.hbm [resolvable:$true] %s294_s19 }
  0x17   : > { %1641 = dma.hbm_to_vmem [thread:$0]  (!%p2157_p7), %s295_s19, 1024, %s297_s22, [#allocation5], %s2398_s24, %s2398_s24, %s2400_s25  }
  0x18   : > { %p97_p10 = scmp.eq.s32.totalorder %s2042_s14, 0  ;;  %s2436_s26 = smov (%p37_p8, %s35_s26), 0 }
  0x19   : > { %2416 = sst [smem:[#allocation23_spill]] %s2436_s26  ;;  %p1665_p12 = scmp.lt.s32.totalorder %s2042_s14, 3 }
  0x1a   : > { %p2173_p11 = por %p97_p10, %p96_p9  ;;  %s86_s29 = ssub.s32 %s2038_s13, %s2436_s26 }
  0x1b   : > { %s355_s30 = sand.u32 1, %s2042_s14   ;;  %p87_p13 = scmp.eq.s32.totalorder %s86_s29, 0 }
  0x1c   : > { %s357_s17 = sand.u32 1, %s2030_s11   ;;  %s2403_s18 = sshll.u32 %s2038_s13, 6 }
  0x1d   : > { %s2184_s19 = scalar_select %p87_p13, %s2030_s11, %s89_s27  }
  0x1e   : > { %s2186_s21 = sshll.u32 %s357_s17, 6  ;;  %s2419_s2 = sld [smem:[#allocation27_spill]] }
  0x1f   : > { %2418 = sst [smem:[#allocation24_spill]] %s2184_s19  ;;  %s359_s9 = scalar_lea.vmem [#allocation9], %s2186_s21 }
  0x20   : > { %s367_s26 = sshll.u32 %s359_s9, 4  ;;  %p2198_p0 = pnand %p1665_p12, %p2173_p11  ;;  %s368_s26 = int_to_ptr.vmem [resolvable:$true] %s367_s26 }
  0x21   : > { %s2421_s1 = sld [smem:[#allocation26_spill]]  ;;  %s2205_s22 = scalar_lea.sflag [#allocation5], %s355_s30 }
  0x22   : > { %s2047_s9 = smov [#allocation7]   ;;  %s2424_s3 = sld [smem:[#allocation28_spill]] }
  0x23   : > { %s310_s28 = sshll.u32 %s2047_s9, 4  ;;  %s380_s29 = scalar_lea.vmem [#allocation10], %s357_s17  ;;  %s311_s28 = int_to_ptr.vmem [resolvable:$true] %s310_s28 }
  0x24   : > { %s364_s25 = scalar_lea.hbm %s2419_s2, %s2403_s18  ;;  %s2423_s18 = smov 64  }
  0x25   : > { %s365_s0 = sshll.u32 %s364_s25, 4  ;;  %s2422_s25 = smov 4   ;;  %s366_s0 = int_to_ptr.hbm [resolvable:$true] %s365_s0 }
  0x26   : > { %1654 = dma.hbm_to_vmem [thread:$0]  (!%p2198_p0), %s366_s0, 1024, %s368_s26, %s2205_s22, %s2423_s18, %s2423_s18, %s2422_s25  }
  0x27   : > { %s308_s24 = sshll.u32 %s2421_s1, 4  ;;  %s387_s1 = sshll.u32 %s380_s29, 4  ;;  %s309_s24 = int_to_ptr.hbm [resolvable:$true] %s308_s24  ;;  %s388_s1 = int_to_ptr.vmem [resolvable:$true] %s387_s1 }
  0x28   : > { %s383_s19 = scalar_lea.hbm %s2424_s3, %s2038_s13  ;;  %s2425_s6 = sld [smem:[#allocation29_spill]] }
  0x29   : > { %1644 = dma.hbm_to_vmem [thread:$0]  (!%p2157_p7), %s309_s24, 1024, %s311_s28, [#allocation8], %s2423_s18, %s2423_s18, %s2422_s25  }
  0x2a   : > { %s385_s30 = sshll.u32 %s383_s19, 4  ;;  %s2048_s2 = smov [#allocation12]   ;;  %s386_s30 = int_to_ptr.hbm [resolvable:$true] %s385_s30 }
  0x2b   : > { %1657 = dma.hbm_to_vmem [thread:$0]  (!%p2198_p0), %s386_s30, 16, %s388_s1, %s2205_s22  }
  0x2c   : > { %s327_s11 = sshll.u32 %s2048_s2, 4  ;;  %s336_s17 = sshll.u32 %s2395_s7, 4  ;;  %s328_s11 = int_to_ptr.vmem [resolvable:$true] %s327_s11  ;;  %s337_s17 = int_to_ptr.hbm [resolvable:$true] %s336_s17 }
  0x2d   : > { %s2049_s28 = smov [#allocation13]   ;;  %s2050_s19 = smov 128  }
  0x2e   : > { %s325_s9 = sshll.u32 %s2425_s6, 4  ;;  %s338_s1 = sshll.u32 %s2049_s28, 4  ;;  %s326_s9 = int_to_ptr.hbm [resolvable:$true] %s325_s9  ;;  %s339_s1 = int_to_ptr.vmem [resolvable:$true] %s338_s1 }
  0x2f   : > { %1647 = dma.hbm_to_vmem [thread:$0]  (!%p2157_p7), %s326_s9, 128, %s328_s11, [#allocation8]  }
  0x30   : > { %s2051_s30 = smov 8   ;;  %s2426_s29 = sshll.u32 %s2038_s13, 6 }
  0x31   : > { %1650 = dma.hbm_to_vmem [thread:$0]  (!%p2157_p7), %s337_s17, 2048, %s339_s1, [#allocation14], %s2050_s19, %s2050_s19, %s2051_s30  }
  0x32   : > { %s403_s2 = scalar_lea.hbm %s2392_s4, %s2426_s29  ;;  %s398_s3 = scalar_lea.vmem [#allocation11], %s2186_s21 }
  0x33   : > { %s404_s6 = sshll.u32 %s403_s2, 4  ;;  %s406_s24 = sshll.u32 %s398_s3, 4  ;;  %s405_s6 = int_to_ptr.hbm [resolvable:$true] %s404_s6  ;;  %s407_s24 = int_to_ptr.vmem [resolvable:$true] %s406_s24 }
  0x34   : > { %1660 = dma.hbm_to_vmem [thread:$0]  (!%p2198_p0), %s405_s6, 1024, %s407_s24, %s2205_s22, %s2423_s18, %s2423_s18, %s2422_s25  }
  0x35   : > { %424 = sbr.rel (%p2149_p5) target bundleno = 993 (0x3e1), region = 56 }
  0x3a   : > { %1997 = dma.done.wait (%p103_p1), [#allocation5], 1024  }
  0x3b   : > { %1999 = vsyncadd (%p103_p1), [#allocation5], 4294966272 }
  0x3c   : > { %2001 = dma.done.wait (%p103_p1), [#allocation8], 1024  }
  0x3d   : > { %2003 = vsyncadd (%p103_p1), [#allocation8], 4294966272  ;;  %s436_s23 = sand.u32 1, %s2134_s15   ;;  %s438_s6 = sand.u32 1, %s2026_s10  }
  0x3e   : > { %s1355_s18 = sshll.u32 %s438_s6, 6  ;;  %s437_s20 = scalar_lea.sflag [#allocation5], %s436_s23 }
  0x3f   : > { %s2259_s21 = scalar_lea.vmem [#allocation9], %s1355_s18 }
  0x40   : > { %2005 = dma.done.wait (%p2142_p4), %s437_s20, 2064  }
  0x41   : > { %2007 = vsyncadd (%p2142_p4), %s437_s20, 4294965232  ;;  %s2265_s27 = scalar_lea.vmem [#allocation10], %s438_s6  ;;  %s2267_s22 = scalar_lea.vmem [#allocation11], %s1355_s18 }
  0x42   : > { %2009 = dma.done.wait (%p103_p1), [#allocation8], 128  }
  0x43   : > { %2011 = vsyncadd (%p103_p1), [#allocation8], 4294967168 }
  0x44   : > { %2013 = dma.done.wait (%p103_p1), [#allocation14], 2048  }
  0x45   : > { %2015 = vsyncadd (%p103_p1), [#allocation14], 4294965248  ;;  %p513_p2 = scmp.lt.s32.totalorder %s2034_s12, 2  ;;  %p517_p3 = scmp.eq.s32.totalorder %s2034_s12, 2 }
  0x46   : > { %p519_p4 = scmp.eq.s32.totalorder %s2034_s12, 0 }
  0x47   : > { %s2281_s16 = scalar_select %p513_p2, %s2034_s12, 2  ;;  %v2052_v0 = vmov (%p519_p4), 0   ;;  %v540_v1 = vld [vmem:[#allocation7] sm:$0xff] (%p519_p4)   ;;  %v542_v2 = vld [vmem:[#allocation7 + $0x8] sm:$0xff] (%p519_p4)   ;;  %v544_v3 = vld [vmem:[#allocation7 + $0x10] sm:$0xff] (%p519_p4)  }
  0x48   : > { %523 = sbr.rel (!%p519_p4) target bundleno = 96 (0x60), region = 88  ;;  %524 = vst [vmem:[#allocation2] sm:$0xf] (%p519_p4), %v2052_v0  ;;  %v546_v4 = vld [vmem:[#allocation7 + $0x18] sm:$0xff] (%p519_p4)   ;;  %v548_v5 = vld [vmem:[#allocation7 + $0x20] sm:$0xff] (%p519_p4)   ;;  %v550_v6 = vld [vmem:[#allocation7 + $0x28] sm:$0xff] (%p519_p4)  }
  0x49   : > { %s515_s11 = scalar_lea.vmem %s2393_s5, %s2281_s16  ;;  %525 = vst [vmem:[#allocation2 + $0x4] sm:$0xf] (%p519_p4), %v2052_v0  ;;  %v552_v7 = vld [vmem:[#allocation7 + $0x30] sm:$0xff] (%p519_p4)   ;;  %v554_v8 = vld [vmem:[#allocation7 + $0x38] sm:$0xff] (%p519_p4)  }
  0x4a   : > { %526 = vst [vmem:[#allocation2 + $0x8] sm:$0xf] (%p519_p4), %v2052_v0 }
  0x4b   : > { %527 = vst [vmem:[#allocation2 + $0xc] sm:$0xf] (%p519_p4), %v2052_v0 }
  0x4c   : > { %528 = vst [vmem:[#allocation2 + $0x10] sm:$0xf] (%p519_p4), %v2052_v0 }
  0x4d   : > { %529 = vst [vmem:[#allocation2 + $0x14] sm:$0xf] %v2052_v0 }
  0x4e   : > { %530 = vst [vmem:[#allocation2 + $0x18] sm:$0xf] %v2052_v0 }
  0x4f   : > { %531 = vst [vmem:[#allocation2 + $0x1c] sm:$0xf] %v2052_v0 }
  0x50   : > { %532 = vst [vmem:[#allocation2 + $0x20] sm:$0xf] %v2052_v0 }
  0x51   : > { %533 = vst [vmem:[#allocation2 + $0x24] sm:$0xf] %v2052_v0 }
  0x52   : > { %534 = vst [vmem:[#allocation2 + $0x28] sm:$0xf] %v2052_v0 }
  0x53   : > { %535 = vst [vmem:[#allocation2 + $0x2c] sm:$0xf] %v2052_v0 }
  0x54   : > { %536 = vst [vmem:[#allocation2 + $0x30] sm:$0xf] %v2052_v0 }
  0x55   : > { %537 = vst [vmem:[#allocation2 + $0x34] sm:$0xf] %v2052_v0 }
  0x56   : > { %538 = vst [vmem:[#allocation2 + $0x38] sm:$0xf] %v2052_v0 }
  0x57   : > { %539 = vst [vmem:[#allocation2 + $0x3c] sm:$0xf] %v2052_v0 }
  0x58   : > { %556 = vst [vmem:[#allocation2 + $0x40] sm:$0xff] %v540_v1  }
  0x59   : > { %558 = vst [vmem:[#allocation2 + $0x48] sm:$0xff] %v542_v2  }
  0x5a   : > { %560 = vst [vmem:[#allocation2 + $0x50] sm:$0xff] %v544_v3  }
  0x5b   : > { %562 = vst [vmem:[#allocation2 + $0x58] sm:$0xff] %v546_v4  }
  0x5c   : > { %564 = vst [vmem:[#allocation2 + $0x60] sm:$0xff] %v548_v5  }
  0x5d   : > { %566 = vst [vmem:[#allocation2 + $0x68] sm:$0xff] %v550_v6  }
  0x5e   : > { %568 = vst [vmem:[#allocation2 + $0x70] sm:$0xff] %v552_v7  }
  0x5f   : > { %570 = vst [vmem:[#allocation2 + $0x78] sm:$0xff] %v554_v8  }
  0x60 PF: > { %s572_s17 = sadd.s32 1, %s2034_s12  ;;  %p585_p1 = scmp.lt.s32.totalorder %s2034_s12, 0  ;;  %v1516_v17 = vld [vmem:[#allocation4] sm:$0xff]  ;;  %v1522_v18 = vld [vmem:[#allocation4 + $0x30] sm:$0xff]  ;;  %v1517_v19 = vld [vmem:[#allocation4 + $0x8] sm:$0xff] }
  0x61   : > { %p573_p5 = scmp.lt.s32.totalorder %s572_s17, 0  ;;  %s574_s28 = ssub.s32 0, %s572_s17  ;;  %v1523_v20 = vld [vmem:[#allocation4 + $0x38] sm:$0xff]  ;;  %v1518_v21 = vld [vmem:[#allocation4 + $0x10] sm:$0xff]  ;;  %v1529_v25 = vld [vmem:[%s2259_s21 + $0x28] sm:$0xff] }
  0x62   : > { %s1360_s1 = smin.u32 %s574_s28, %s572_s17  ;;  %s586_s19 = ssub.s32 0, %s2034_s12  ;;  %v1519_v22 = vld [vmem:[#allocation4 + $0x18] sm:$0xff]  ;;  %v1530_v24 = vld [vmem:[%s2259_s21 + $0x30] sm:$0xff]  ;;  %v1528_v26 = vld [vmem:[%s2259_s21 + $0x20] sm:$0xff] }
  0x63   : > { %s576_s30 = sand.u32 1, %s1360_s1   ;;  %s1363_s29 = smin.u32 %s2034_s12, %s586_s19  ;;  %v1531_v23 = vld [vmem:[%s2259_s21 + $0x38] sm:$0xff]  ;;  %v1520_v27 = vld [vmem:[#allocation4 + $0x20] sm:$0xff]  ;;  %v1521_v29 = vld [vmem:[#allocation4 + $0x28] sm:$0xff] }
  0x64   : > { %s577_s0 = ssub.s32 0, %s576_s30  ;;  %s588_s26 = sand.u32 1, %s1363_s29   ;;  %855 = vmatpush.bf16.msra.mxu1 %v1531_v23  ;;  %v1527_v28 = vld [vmem:[%s2259_s21 + $0x18] sm:$0xff]  ;;  %v1526_v30 = vld [vmem:[%s2259_s21 + $0x10] sm:$0xff]  ;;  %v1525_v31 = vld [vmem:[%s2259_s21 + $0x8] sm:$0xff] }
  0x65   : > { %s2438_s0 = smov (!%p573_p5, %s577_s0), %s576_s30  ;;  %s589_s2 = ssub.s32 0, %s588_s26  ;;  %v1524_v32 = vld [vmem:[%s2259_s21] sm:$0xff]  ;;  %v1538_v52 = vld [vmem:[%s2267_s22 + $0x30] sm:$0xff]  ;;  %v1537_v54 = vld [vmem:[%s2267_s22 + $0x28] sm:$0xff] }
  0x66   : > { %p1362_p6 = scmp.lt.s32.totalorder %s2438_s0, 0  ;;  %s583_s3 = sadd.s32 2, %s2438_s0  ;;  %v1539_v51 = vld [vmem:[%s2267_s22 + $0x38] sm:$0xff]  ;;  %v1536_v55 = vld [vmem:[%s2267_s22 + $0x20] sm:$0xff]  ;;  %v1534_v62 = vld [vmem:[%s2267_s22 + $0x10] sm:$0xff] }
  0x67   : > { %s2440_s2 = smov (!%p585_p1, %s589_s2), %s588_s26  ;;  %996 = vmatpush.bf16.msra.mxu2 %v1539_v51  ;;  %v1535_v61 = vld [vmem:[%s2267_s22 + $0x18] sm:$0xff]  ;;  %v1533_v63 = vld [vmem:[%s2267_s22 + $0x8] sm:$0xff]  ;;  %v1532_v0 = vld [vmem:[%s2267_s22] sm:$0xff] }
  0x68   : > { %s2442_s3 = smov (!%p1362_p6, %s583_s3), %s2438_s0  ;;  %p1365_p7 = scmp.lt.s32.totalorder %s2440_s2, 0  ;;  %856 = vmatpush.bf16.msra.mxu1 %v1530_v24  ;;  %v1731_v2 = vld [vmem:[%s2265_s27] ss:$0 sm:$0xff] }
  0x69   : > { %s595_s24 = sadd.s32 2, %s2440_s2  ;;  %s1366_s23 = sshll.u32 %s2442_s3, 7 }
  0x6a   : > { %s2444_s24 = smov (!%p1365_p7, %s595_s24), %s2440_s2  ;;  %s598_s6 = sshra.s32 %s1366_s23, 3 }
  0x6b   : > { %s1367_s18 = sshll.u32 %s598_s6, 2  ;;  %997 = vmatpush.bf16.msra.mxu2 %v1538_v52  ;;  %s1497_s22 = sshll.u32 (!%p517_p3), %s2444_s24, 7 }
  0x6c   : > { %s601_s20 = scalar_lea.vmem [#allocation2], %s1367_s18  ;;  %857 = vmatpush.bf16.msra.mxu1 %v1529_v25  ;;  %s1084_s16 = sshra.s32 (!%p517_p3), %s1497_s22, 3 }
  0x6d   : > { %v1515_v9 = vld [vmem:[%s601_s20 + $0x38] sm:$0xff]  ;;  %v1514_v10 = vld [vmem:[%s601_s20 + $0x30] sm:$0xff]  ;;  %v1513_v11 = vld [vmem:[%s601_s20 + $0x28] sm:$0xff]  ;;  %s1498_s25 = sshll.u32 (!%p517_p3), %s1084_s16, 2 }
  0x6e   : > { %730 = vmatpush.bf16.msra.mxu0 %v1515_v9  ;;  %1588 = vmatpush.bf16.msra.mxu3 %v1515_v9  ;;  %v1512_v12 = vld [vmem:[%s601_s20 + $0x20] sm:$0xff]  ;;  %v1511_v13 = vld [vmem:[%s601_s20 + $0x18] sm:$0xff]  ;;  %v1510_v14 = vld [vmem:[%s601_s20 + $0x10] sm:$0xff]  ;;  %s1087_s9 = scalar_lea.vmem (!%p517_p3), [#allocation2], %s1498_s25 }
  0x6f   : > { %v1509_v15 = vld [vmem:[%s601_s20 + $0x8] sm:$0xff]  ;;  %v1508_v16 = vld [vmem:[%s601_s20] sm:$0xff]  ;;  %998 = vmatpush.bf16.msra.mxu2 %v1537_v54 }
  0x70   : > { %858 = vmatpush.bf16.msra.mxu1 %v1528_v26 }
  0x72   : > { %731 = vmatpush.bf16.msra.mxu0 %v1514_v10  ;;  %1589 = vmatpush.bf16.msra.mxu3 %v1514_v10 }
  0x73   : > { %999 = vmatpush.bf16.msra.mxu2 %v1536_v55 }
  0x74   : > { %859 = vmatpush.bf16.msra.mxu1 %v1527_v28 }
  0x76   : > { %732 = vmatpush.bf16.msra.mxu0 %v1513_v11  ;;  %1590 = vmatpush.bf16.msra.mxu3 %v1513_v11 }
  0x77   : > { %1000 = vmatpush.bf16.msra.mxu2 %v1535_v61 }
  0x78   : > { %860 = vmatpush.bf16.msra.mxu1 %v1526_v30 }
  0x7a   : > { %733 = vmatpush.bf16.msra.mxu0 %v1512_v12  ;;  %1591 = vmatpush.bf16.msra.mxu3 %v1512_v12 }
  0x7b   : > { %1001 = vmatpush.bf16.msra.mxu2 %v1534_v62 }
  0x7c   : > { %861 = vmatpush.bf16.msra.mxu1 %v1525_v31 }
  0x7e   : > { %734 = vmatpush.bf16.msra.mxu0 %v1511_v13  ;;  %1592 = vmatpush.bf16.msra.mxu3 %v1511_v13 }
  0x7f   : > { %1002 = vmatpush.bf16.msra.mxu2 %v1533_v63 }
  0x80   : > { %862 = vmatpush.bf16.msra.mxu1 %v1524_v32 }
  0x82   : > { %735 = vmatpush.bf16.msra.mxu0 %v1510_v14  ;;  %1593 = vmatpush.bf16.msra.mxu3 %v1510_v14 }
  0x83   : > { %1003 = vmatpush.bf16.msra.mxu2 %v1532_v0 }
  0x86   : > { %736 = vmatpush.bf16.msra.mxu0 %v1509_v15  ;;  %1594 = vmatpush.bf16.msra.mxu3 %v1509_v15 }
  0x8a   : > { %737 = vmatpush.bf16.msra.mxu0 %v1508_v16  ;;  %1595 = vmatpush.bf16.msra.mxu3 %v1508_v16 }
  0x8d   : > { %738 = vmatmul.bf16.vlgmr.msra.gmra.mxu0 %v1516_v17  ;;  %768 = vmatmul.bf16.vlgmr.msra.gmra.mxu3 %v1522_v18 }
  0x8e   : > { %1596 = vmatpush.bf16.msrb.mxu3 %v1531_v23 }
  0x92   : > { %1597 = vmatpush.bf16.msrb.mxu3 %v1530_v24 }
  0x96   : > { %1598 = vmatpush.bf16.msrb.mxu3 %v1529_v25 }
  0x9a   : > { %1599 = vmatpush.bf16.msrb.mxu3 %v1528_v26 }
  0x9d   : > { %743 = vmatmul.bf16.gmra.mxu0 %v1517_v19  ;;  %773 = vmatmul.bf16.gmra.mxu3 %v1523_v20 }
  0x9e   : > { %1600 = vmatpush.bf16.msrb.mxu3 %v1527_v28 }
  0xa2   : > { %1601 = vmatpush.bf16.msrb.mxu3 %v1526_v30 }
  0xa6   : > { %1602 = vmatpush.bf16.msrb.mxu3 %v1525_v31 }
  0xaa   : > { %1603 = vmatpush.bf16.msrb.mxu3 %v1524_v32 }
  0xad   : > { %748 = vmatmul.bf16.gmra.mxu0 %v1518_v21 }
  0xae   : > { %1604 = vmatpush.bf16.msra.mxu3 %v1539_v51 }
  0xb2   : > { %1605 = vmatpush.bf16.msra.mxu3 %v1538_v52 }
  0xb6   : > { %1606 = vmatpush.bf16.msra.mxu3 %v1537_v54 }
  0xba   : > { %1607 = vmatpush.bf16.msra.mxu3 %v1536_v55 }
  0xbd   : > { %753 = vmatmul.bf16.gmra.mxu0 %v1519_v22 }
  0xbe   : > { %1608 = vmatpush.bf16.msra.mxu3 %v1535_v61 }
  0xc2   : > { %1609 = vmatpush.bf16.msra.mxu3 %v1534_v62 }
  0xc6   : > { %1610 = vmatpush.bf16.msra.mxu3 %v1533_v63 }
  0xca   : > { %1611 = vmatpush.bf16.msra.mxu3 %v1532_v0 }
  0xcd   : > { %758 = vmatmul.bf16.gmra.mxu0 %v1520_v27 }
  0xdd   : > { %763 = vmatmul.bf16.gmra.mxu0 %v1521_v29 }
 0x10a   : > { %v739_v33 = vpop.f32.mrf.mxu0 }
 0x110   : > { %v769_v34 = vpop.f32.mrf.mxu3 }
 0x112   : > { %v741_v35 = vpop.f32.mrf.mxu0 }
 0x113   : > { %v779_v36 = vpack.c.bf16 %v741_v35, %v739_v33 }
 0x115   : > { %863 = vmatmul.bf16.vlgmr.msra.gmra.mxu1 %v779_v36 }
 0x118   : > { %v771_v37 = vpop.f32.mrf.mxu3 }
 0x119   : > { %v785_v38 = vpack.c.bf16 %v771_v37, %v769_v34 }
 0x11a   : > { %v744_v39 = vpop.f32.mrf.mxu0 }
 0x11b   : > { %893 = vmatmul.bf16.vlgmr.msrb.gmra.mxu3 %v785_v38 }
 0x120   : > { %v774_v40 = vpop.f32.mrf.mxu3 }
 0x122   : > { %v746_v41 = vpop.f32.mrf.mxu0 }
 0x123   : > { %v780_v42 = vpack.c.bf16 %v746_v41, %v744_v39 }
 0x125   : > { %868 = vmatmul.bf16.gmra.mxu1 %v780_v42 }
 0x128   : > { %v776_v43 = vpop.f32.mrf.mxu3 }
 0x129   : > { %v786_v44 = vpack.c.bf16 %v776_v43, %v774_v40 }
 0x12a   : > { %v749_v45 = vpop.f32.mrf.mxu0 }
 0x12b   : > { %898 = vmatmul.bf16.gmra.mxu3 %v786_v44 }
 0x132   : > { %v751_v46 = vpop.f32.mrf.mxu0 }
 0x133   : > { %v781_v47 = vpack.c.bf16 %v751_v46, %v749_v45 }
 0x135   : > { %873 = vmatmul.bf16.gmra.mxu1 %v781_v47 }
 0x13a   : > { %v754_v48 = vpop.f32.mrf.mxu0 }
 0x142   : > { %v756_v49 = vpop.f32.mrf.mxu0 }
 0x143   : > { %v782_v50 = vpack.c.bf16 %v756_v49, %v754_v48 }
 0x145   : > { %878 = vmatmul.bf16.gmra.mxu1 %v782_v50 }
 0x14a   : > { %v759_v53 = vpop.f32.mrf.mxu0 }
 0x152   : > { %v761_v56 = vpop.f32.mrf.mxu0 }
 0x153   : > { %v783_v57 = vpack.c.bf16 %v761_v56, %v759_v53 }
 0x155   : > { %883 = vmatmul.bf16.gmra.mxu1 %v783_v57 }
 0x15a   : > { %v764_v58 = vpop.f32.mrf.mxu0 }
 0x162   : > { %v766_v59 = vpop.f32.mrf.mxu0 }
 0x163   : > { %v784_v60 = vpack.c.bf16 %v766_v59, %v764_v58  ;;  %v1732_v58 = vld [vmem:[%s515_s11] ss:$0 sm:$0xff] }
 0x165   : > { %888 = vmatmul.bf16.gmra.mxu1 %v784_v60 }
 0x192   : > { %v864_v1 = vpop.f32.mrf.mxu1 }
 0x193   : > { %v865_v3 = vadd.f32 %v1731_v2, %v864_v1 }
 0x195   : > { %v904_v6 = vmax.f32 %v865_v3, 0.0 }
 0x19a   : > { %v866_v4 = vpop.f32.mrf.mxu1 }
 0x19b   : > { %v867_v5 = vadd.f32 %v1731_v2, %v866_v4 }
 0x19d   : > { %v905_v7 = vmax.f32 %v867_v5, 0.0 }
 0x19e   : > { %v894_v8 = vpop.f32.mrf.mxu3 }
 0x19f   : > { %v920_v9 = vpack.c.bf16 %v905_v7, %v904_v6  ;;  %v895_v11 = vadd.f32 %v1731_v2, %v894_v8 }
 0x1a1   : > { %1004 = vmatmul.bf16.vlgmr.msra.gmra.mxu2 %v920_v9  ;;  %v916_v13 = vmax.f32 %v895_v11, 0.0 }
 0x1a2   : > { %v869_v10 = vpop.f32.mrf.mxu1 }
 0x1a3   : > { %v870_v15 = vadd.f32 %v1731_v2, %v869_v10 }
 0x1a5   : > { %v906_v20 = vmax.f32 %v870_v15, 0.0 }
 0x1a6   : > { %v896_v12 = vpop.f32.mrf.mxu3 }
 0x1a7   : > { %v897_v14 = vadd.f32 %v1731_v2, %v896_v12 }
 0x1a9   : > { %v917_v16 = vmax.f32 %v897_v14, 0.0 }
 0x1aa   : > { %v871_v17 = vpop.f32.mrf.mxu1 }
 0x1ab   : > { %v872_v18 = vadd.f32 %v1731_v2, %v871_v17  ;;  %v926_v19 = vpack.c.bf16 %v917_v16, %v916_v13 }
 0x1ad   : > { %v907_v21 = vmax.f32 %v872_v18, 0.0  ;;  %1034 = vmatmul.bf16.vlgmr.msra.gmra.mxu3 %v926_v19 }
 0x1ae   : > { %v899_v22 = vpop.f32.mrf.mxu3 }
 0x1af   : > { %v921_v23 = vpack.c.bf16 %v907_v21, %v906_v20  ;;  %v900_v25 = vadd.f32 %v1731_v2, %v899_v22 }
 0x1b1   : > { %1009 = vmatmul.bf16.gmra.mxu2 %v921_v23  ;;  %v918_v27 = vmax.f32 %v900_v25, 0.0 }
 0x1b2   : > { %v874_v24 = vpop.f32.mrf.mxu1 }
 0x1b3   : > { %v875_v29 = vadd.f32 %v1731_v2, %v874_v24 }
 0x1b5   : > { %v908_v34 = vmax.f32 %v875_v29, 0.0 }
 0x1b6   : > { %v901_v26 = vpop.f32.mrf.mxu3 }
 0x1b7   : > { %v902_v28 = vadd.f32 %v1731_v2, %v901_v26 }
 0x1b9   : > { %v919_v30 = vmax.f32 %v902_v28, 0.0 }
 0x1ba   : > { %v876_v31 = vpop.f32.mrf.mxu1 }
 0x1bb   : > { %v877_v32 = vadd.f32 %v1731_v2, %v876_v31  ;;  %v927_v33 = vpack.c.bf16 %v919_v30, %v918_v27 }
 0x1bd   : > { %v909_v35 = vmax.f32 %v877_v32, 0.0  ;;  %1039 = vmatmul.bf16.gmra.mxu3 %v927_v33 }
 0x1bf   : > { %v922_v36 = vpack.c.bf16 %v909_v35, %v908_v34 }
 0x1c1   : > { %1014 = vmatmul.bf16.gmra.mxu2 %v922_v36 }
 0x1c2   : > { %v879_v37 = vpop.f32.mrf.mxu1 }
 0x1c3   : > { %v880_v38 = vadd.f32 %v1731_v2, %v879_v37 }
 0x1c5   : > { %v910_v41 = vmax.f32 %v880_v38, 0.0 }
 0x1ca   : > { %v881_v39 = vpop.f32.mrf.mxu1 }
 0x1cb   : > { %v882_v40 = vadd.f32 %v1731_v2, %v881_v39 }
 0x1cd   : > { %v911_v42 = vmax.f32 %v882_v40, 0.0 }
 0x1cf   : > { %v923_v43 = vpack.c.bf16 %v911_v42, %v910_v41 }
 0x1d1   : > { %1019 = vmatmul.bf16.gmra.mxu2 %v923_v43 }
 0x1d2   : > { %v884_v44 = vpop.f32.mrf.mxu1 }
 0x1d3   : > { %v885_v45 = vadd.f32 %v1731_v2, %v884_v44 }
 0x1d5   : > { %v912_v48 = vmax.f32 %v885_v45, 0.0 }
 0x1da   : > { %v886_v46 = vpop.f32.mrf.mxu1 }
 0x1db   : > { %v887_v47 = vadd.f32 %v1731_v2, %v886_v46 }
 0x1dd   : > { %v913_v49 = vmax.f32 %v887_v47, 0.0 }
 0x1df   : > { %v924_v50 = vpack.c.bf16 %v913_v49, %v912_v48 }
 0x1e1   : > { %1024 = vmatmul.bf16.gmra.mxu2 %v924_v50 }
 0x1e2   : > { %v889_v51 = vpop.f32.mrf.mxu1 }
 0x1e3   : > { %v890_v52 = vadd.f32 %v1731_v2, %v889_v51 }
 0x1e5   : > { %v914_v55 = vmax.f32 %v890_v52, 0.0 }
 0x1ea   : > { %v891_v53 = vpop.f32.mrf.mxu1 }
 0x1eb   : > { %v892_v54 = vadd.f32 %v1731_v2, %v891_v53 }
 0x1ed   : > { %v915_v56 = vmax.f32 %v892_v54, 0.0 }
 0x1ef   : > { %v925_v57 = vpack.c.bf16 %v915_v56, %v914_v55 }
 0x1f1   : > { %1029 = vmatmul.bf16.gmra.mxu2 %v925_v57 }
 0x224   : > { %v1005_v59 = vpop.f32.mrf.mxu2 }
 0x225   : > { %v2315_v60 = vadd.f32 %v1732_v58, %v1005_v59 }
 0x22c   : > { %v1007_v61 = vpop.f32.mrf.mxu2 }
 0x22d   : > { %v2317_v62 = vadd.f32 %v1732_v58, %v1007_v61 }
 0x230   : > { %v1035_v63 = vpop.f32.mrf.mxu3 }
 0x231   : > { %v2319_v0 = vadd.f32 %v1732_v58, %v1035_v63 }
 0x234   : > { %v1010_v1 = vpop.f32.mrf.mxu2 }
 0x235   : > { %v2321_v2 = vadd.f32 %v1732_v58, %v1010_v1 }
 0x238   : > { %v1037_v3 = vpop.f32.mrf.mxu3 }
 0x239   : > { %v2323_v4 = vadd.f32 %v1732_v58, %v1037_v3 }
 0x23c   : > { %v1012_v5 = vpop.f32.mrf.mxu2 }
 0x23d   : > { %v2325_v6 = vadd.f32 %v1732_v58, %v1012_v5 }
 0x240   : > { %v1040_v7 = vpop.f32.mrf.mxu3 }
 0x241   : > { %v2327_v8 = vadd.f32 %v1732_v58, %v1040_v7 }
 0x244   : > { %v1015_v9 = vpop.f32.mrf.mxu2 }
 0x245   : > { %v2329_v10 = vadd.f32 %v1732_v58, %v1015_v9 }
 0x248   : > { %v1042_v11 = vpop.f32.mrf.mxu3 }
 0x249   : > { %v1043_v12 = vadd.f32 %v1732_v58, %v1042_v11 }
 0x24c   : > { %v1017_v13 = vpop.f32.mrf.mxu2 }
 0x24d   : > { %v2331_v14 = vadd.f32 %v1732_v58, %v1017_v13 }
 0x254   : > { %v1020_v15 = vpop.f32.mrf.mxu2 }
 0x255   : > { %v2333_v16 = vadd.f32 %v1732_v58, %v1020_v15 }
 0x25c   : > { %v1022_v17 = vpop.f32.mrf.mxu2 }
 0x25d   : > { %v1023_v18 = vadd.f32 %v1732_v58, %v1022_v17 }
 0x264   : > { %v1025_v19 = vpop.f32.mrf.mxu2 }
 0x265   : > { %v1026_v20 = vadd.f32 %v1732_v58, %v1025_v19 }
 0x26c   : > { %v1027_v21 = vpop.f32.mrf.mxu2 }
 0x26d   : > { %v1028_v22 = vadd.f32 %v1732_v58, %v1027_v21 }
 0x274   : > { %v1030_v23 = vpop.f32.mrf.mxu2 }
 0x275   : > { %v1031_v24 = vadd.f32 %v1732_v58, %v1030_v23 }
 0x279   : > { %1048 = sbr.rel (%p517_p3) target bundleno = 650 (0x28a), region = 92 }
 0x27c   : > { %v1032_v25 = vpop.f32.mrf.mxu2 }
 0x27d   : > { %v1033_v26 = vadd.f32 %v1732_v58, %v1032_v25 }
 0x27e   : > { %v1052_v27 = vmax.f32 %v2315_v60, 0.0  ;;  %v1053_v28 = vmax.f32 %v2317_v62, 0.0  ;;  %v1054_v29 = vmax.f32 %v2321_v2, 0.0  ;;  %v1055_v30 = vmax.f32 %v2325_v6, 0.0 }
 0x27f   : > { %v1056_v31 = vmax.f32 %v2329_v10, 0.0  ;;  %v1057_v32 = vmax.f32 %v2331_v14, 0.0  ;;  %v1058_v33 = vmax.f32 %v2333_v16, 0.0  ;;  %v1059_v34 = vmax.f32 %v1023_v18, 0.0 }
 0x280   : > { %v1544_v35 = vpack.c.bf16 %v1053_v28, %v1052_v27  ;;  %v1549_v36 = vpack.c.bf16 %v1055_v30, %v1054_v29  ;;  %v1060_v37 = vmax.f32 %v1026_v20, 0.0  ;;  %v1061_v38 = vmax.f32 %v1028_v22, 0.0 }
 0x281   : > { %v1554_v39 = vpack.c.bf16 %v1057_v32, %v1056_v31  ;;  %v1559_v40 = vpack.c.bf16 %v1059_v34, %v1058_v33  ;;  %v1062_v41 = vmax.f32 %v1031_v24, 0.0  ;;  %v1063_v42 = vmax.f32 %v1033_v26, 0.0 }
 0x282   : > { %1545 = vst [vmem:[%s1087_s9] sm:$0xff] %v1544_v35   ;;  %v1564_v43 = vpack.c.bf16 %v1061_v38, %v1060_v37  ;;  %v1064_v44 = vmax.f32 %v2319_v0, 0.0  ;;  %v1065_v45 = vmax.f32 %v2323_v4, 0.0  ;;  %v1066_v46 = vmax.f32 %v2327_v8, 0.0 }
 0x283   : > { %1581 = vst [vmem:[%s1087_s9 + $0x8] sm:$0xff] %v1549_v36   ;;  %v1569_v47 = vpack.c.bf16 %v1063_v42, %v1062_v41  ;;  %v1067_v48 = vmax.f32 %v1043_v12, 0.0 }
 0x284   : > { %1582 = vst [vmem:[%s1087_s9 + $0x10] sm:$0xff] %v1554_v39   ;;  %v1574_v49 = vpack.c.bf16 %v1065_v45, %v1064_v44 }
 0x285   : > { %1583 = vst [vmem:[%s1087_s9 + $0x18] sm:$0xff] %v1559_v40   ;;  %v1579_v50 = vpack.c.bf16 %v1067_v48, %v1066_v46 }
 0x286   : > { %1584 = vst [vmem:[%s1087_s9 + $0x20] sm:$0xff] %v1564_v43  }
 0x287   : > { %1585 = vst [vmem:[%s1087_s9 + $0x28] sm:$0xff] %v1569_v47  }
 0x288   : > { %1586 = vst [vmem:[%s1087_s9 + $0x30] sm:$0xff] %v1574_v49  }
 0x289   : > { %1587 = vst [vmem:[%s1087_s9 + $0x38] sm:$0xff] %v1579_v50  }
 0x28a PF: > { %1107 = sbr.rel (!%p517_p3) target bundleno = 655 (0x28f), region = 96  ;;  %v2053_v51 = vmov (%p517_p3), 0.0  }
 0x28b   : > { %1108 = vst [vmem:[#allocation3] sm:$0xff] (%p517_p3), %v2053_v51 }
 0x28f PF: > { %p1500_p8 = scmp.ne.s32.totalorder %s2034_s12, 2 }
 0x291   : > { %1111 = sbr.rel (%p1500_p8) target bundleno = 822 (0x336), region = 100 }
 0x296   : > { %1114 = vmatpush.msra.mxu0 %v1043_v12  ;;  %v1113_v52 = vld [vmem:[#allocation12] sm:$0xff]  ;;  %v1112_v53 = vld [vmem:[#allocation3] sm:$0xff] }
 0x298   : > { %1115 = vmatpush.msra.mxu0 %v2327_v8 }
 0x29a   : > { %1116 = vmatpush.msra.mxu0 %v2323_v4 }
 0x29c   : > { %1117 = vmatpush.msra.mxu0 %v2319_v0 }
 0x29e   : > { %1118 = vmatpush.msra.mxu0 %v1033_v26 }
 0x2a0   : > { %1119 = vmatpush.msra.mxu0 %v1031_v24 }
 0x2a2   : > { %1120 = vmatpush.msra.mxu0 %v1028_v22 }
 0x2a4   : > { %1121 = vmatpush.msra.mxu0 %v1026_v20 }
 0x2a6   : > { %1122 = vmatpush.msra.mxu0 %v1023_v18 }
 0x2a8   : > { %1123 = vmatpush.msra.mxu0 %v2333_v16 }
 0x2aa   : > { %1124 = vmatpush.msra.mxu0 %v2331_v14 }
 0x2ac   : > { %1125 = vmatpush.msra.mxu0 %v2329_v10 }
 0x2ae   : > { %1126 = vmatpush.msra.mxu0 %v2325_v6 }
 0x2b0   : > { %1127 = vmatpush.msra.mxu0 %v2321_v2 }
 0x2b2   : > { %1128 = vmatpush.msra.mxu0 %v2317_v62 }
 0x2b4   : > { %1129 = vmatpush.msra.mxu0 %v2315_v60 }
 0x2b5   : > { %1130 = vmatmul.f32.vlgmr.msra.gmra.mxu0 %v1113_v52 }
 0x332   : > { %v1131_v54 = vpop.f32.mrf.mxu0 }
 0x333   : > { %v1134_v55 = vadd.f32 %v1131_v54, %v1112_v53 }
 0x335   : > { %1135 = vst [vmem:[#allocation3] sm:$0xff] %v1134_v55 }
 0x336 PF: > { %1137 = sbr.rel (!%p517_p3) target bundleno = 983 (0x3d7), region = 104  ;;  %v1154_v56 = vld [vmem:[#allocation13 + $0x78] sm:$0xff] (%p517_p3)  ;;  %v1153_v57 = vld [vmem:[#allocation13 + $0x70] sm:$0xff] (%p517_p3)  ;;  %v1152_v58 = vld [vmem:[#allocation13 + $0x68] sm:$0xff] (%p517_p3) }
 0x337   : > { %1159 = vmatpush.msra.mxu0 (%p517_p3), %v1154_v56  ;;  %v1151_v59 = vld [vmem:[#allocation13 + $0x60] sm:$0xff] (%p517_p3)  ;;  %v1150_v61 = vld [vmem:[#allocation13 + $0x58] sm:$0xff] (%p517_p3)  ;;  %v1149_v62 = vld [vmem:[#allocation13 + $0x50] sm:$0xff] (%p517_p3) }
 0x338   : > { %v1148_v60 = vld [vmem:[#allocation13 + $0x48] sm:$0xff] (%p517_p3)  ;;  %v1147_v63 = vld [vmem:[#allocation13 + $0x40] sm:$0xff] (%p517_p3)  ;;  %v1146_v0 = vld [vmem:[#allocation13 + $0x38] sm:$0xff] (%p517_p3) }
 0x339   : > { %1160 = vmatpush.msra.mxu0 (%p517_p3), %v1153_v57  ;;  %v1145_v1 = vld [vmem:[#allocation13 + $0x30] sm:$0xff] (%p517_p3)  ;;  %v1144_v2 = vld [vmem:[#allocation13 + $0x28] sm:$0xff] (%p517_p3)  ;;  %v1143_v3 = vld [vmem:[#allocation13 + $0x20] sm:$0xff] (%p517_p3) }
 0x33a   : > { %v1142_v4 = vld [vmem:[#allocation13 + $0x18] sm:$0xff] (%p517_p3)  ;;  %v1141_v5 = vld [vmem:[#allocation13 + $0x10] sm:$0xff] (%p517_p3)  ;;  %v1140_v6 = vld [vmem:[#allocation13 + $0x8] sm:$0xff] (%p517_p3) }
 0x33b   : > { %1161 = vmatpush.msra.mxu0 %v1152_v58  ;;  %v1139_v7 = vld [vmem:[#allocation13] sm:$0xff]  ;;  %v1733_v9 = vld [vmem:[%s2396_s8] ss:$0 sm:$0xff] }
 0x33c   : > { %v1138_v8 = vld [vmem:[#allocation3] sm:$0xff] }
 0x33d   : > { %1162 = vmatpush.msra.mxu0 %v1151_v59 }
 0x33f   : > { %1163 = vmatpush.msra.mxu0 %v1150_v61 }
 0x341   : > { %1164 = vmatpush.msra.mxu0 %v1149_v62 }
 0x343   : > { %1165 = vmatpush.msra.mxu0 %v1148_v60 }
 0x345   : > { %1166 = vmatpush.msra.mxu0 %v1147_v63 }
 0x347   : > { %1167 = vmatpush.msra.mxu0 %v1146_v0 }
 0x349   : > { %1168 = vmatpush.msra.mxu0 %v1145_v1 }
 0x34b   : > { %1169 = vmatpush.msra.mxu0 %v1144_v2 }
 0x34d   : > { %1170 = vmatpush.msra.mxu0 %v1143_v3 }
 0x34f   : > { %1171 = vmatpush.msra.mxu0 %v1142_v4 }
 0x351   : > { %1172 = vmatpush.msra.mxu0 %v1141_v5 }
 0x353   : > { %1173 = vmatpush.msra.mxu0 %v1140_v6 }
 0x355   : > { %1174 = vmatpush.msra.mxu0 %v1139_v7 }
 0x356   : > { %1175 = vmatmul.f32.vlgmr.msra.gmra.mxu0 %v1138_v8 }
 0x3d3   : > { %v1176_v10 = vpop.f32.mrf.mxu0 }
 0x3d4   : > { %v1177_v11 = vadd.f32 %v1733_v9, %v1176_v10 }
 0x3d6   : > { %1179 = vst [vmem:[#allocation15] sm:$0xff] %v1177_v11 }
 0x3d7 PF: > { %p1670_p9 = scmp.eq.s32.totalorder %s2134_s15, 2  ;;  %s2427_s1 = sld [smem:[#allocation30_spill]] }
 0x3d8   : > { %s2054_s30 = smov [#allocation15]  }
 0x3d9   : > { %s1186_s29 = sshll.u32 %s2054_s30, 4  ;;  %s1187_s29 = int_to_ptr.vmem [resolvable:$true] %s1186_s29 }
 0x3dd   : > { %s1188_s19 = sshll.u32 %s2427_s1, 4  ;;  %s1189_s19 = int_to_ptr.hbm [resolvable:$true] %s1188_s19 }
 0x3de   : > { %1635 = dma.vmem_to_hbm [thread:$0]  (%p1670_p9), %s1187_s29, 128, %s1189_s19, [#allocation6]  }
 0x3df   : > { %2017 = dma.done.wait (%p1670_p9), [#allocation6], 128  }
 0x3e0   : > { %2019 = vsyncadd (%p1670_p9), [#allocation6], 4294967168 }
 0x3e1 PF: > { %s23_s14 = sadd.s32 1, %s2042_s14   ;;  %s2428_s0 = sld [smem:[#allocation22_spill]] }
 0x3e2   : > { %p20_p10 = scmp.ge.s32.totalorder %s23_s14, 5   ;;  %s2429_s11 = sld [smem:[#allocation24_spill]] }
 0x3e3   : > { %s2430_s15 = sld [smem:[#allocation23_spill]]  ;;  %s2431_s30 = smov %s2026_s10 }
 0x3e4   : > { %s2433_s12 = smov %s2038_s13 }
 0x3e5   :  { %22 = sbr.rel (!%p20_p10) target bundleno = 13 (0xd), region = 157 }
 0x3e7   : > { %s2432_s10 = smov %s2428_s0 }
 0x3e9   : > { %s2434_s13 = smov %s2430_s15 }
 0x3ea   :  { %1202 = vsyncpa [#allocation5], 1 }
 0x3eb   :  { %1204 = vsyncpa [#allocation5 + $0x1], 1 }
 0x3ec   :  { %1205 = vsyncpa [#allocation8], 1 }
 0x3ed   :  { %1206 = vsyncpa [#allocation14], 1 }
 0x3ee   :  { %1207 = vsyncpa [#allocation6], 1 }
 0x3ef   :  { %1209 = vsyncpa [#allocation6 + $0x1], 1 }

</bundles_post_ra>
